<compile_context>
chip_gen: v5e
topology: v5e:2x2
jax: 0.10.0
libtpu: 0.0.40
codegen_flags: <defaults>
</compile_context>

<pallas_src>
import math

import jax
import jax.numpy as jnp
from jax.experimental import pallas as pl
from jax.experimental.pallas import tpu as pltpu

LANE = 128


# ----------------------------------------------------------------------------
# Helpers
# ----------------------------------------------------------------------------
def _rup(n: int, m: int) -> int:
    return ((n + m - 1) // m) * m


def _pad_to(a: jnp.ndarray, shape) -> jnp.ndarray:
    out = jnp.zeros(shape, a.dtype)
    return out.at[tuple(slice(0, s) for s in a.shape)].set(a)


def _vmem_soft_cap() -> int:
    """Physical-VMEM-aware soft cap for vmem_limit_bytes."""
    try:
        cap = int(getattr(pltpu.get_tpu_info(), "vmem_capacity_bytes"))
    except Exception:
        cap = 64 * 1024 * 1024  # conservative fallback (v7x-sized)
    return int(cap * 0.85)


def build_gcn_norm_adj(edge_index: jnp.ndarray, num_nodes: int) -> jnp.ndarray:
    """Dense D^{-1/2} (A + I) D^{-1/2}, matching PyG GCNConv's gcn_norm (add_self_loops=True)."""
    src, dst = edge_index[0], edge_index[1]
    loop = jnp.arange(num_nodes, dtype=edge_index.dtype)
    src = jnp.concatenate([src, loop])
    dst = jnp.concatenate([dst, loop])
    adj = jnp.zeros((num_nodes, num_nodes), jnp.float32).at[dst, src].add(1.0)
    deg = adj.sum(axis=1)
    dinv = jnp.where(deg > 0, jax.lax.rsqrt(deg), 0.0)
    return dinv[:, None] * adj * dinv[None, :]


def init_params(key, input_dim, hidden_dim, out_dim, num_layers):
    """Deterministic Linear/GCNConv parameters (uniform(+-1/sqrt(fan_in)), like torch defaults)."""
    ks = jax.random.split(key, 4 + num_layers)

    def dense(k, fin, fout):
        k1, k2 = jax.random.split(k)
        bound = 1.0 / math.sqrt(fin)
        w = jax.random.uniform(k1, (fin, fout), jnp.float32, -bound, bound)
        b = jax.random.uniform(k2, (1, fout), jnp.float32, -bound, bound)
        return w, b

    We1, be1 = dense(ks[0], input_dim, hidden_dim)
    We2, be2 = dense(ks[1], hidden_dim, hidden_dim)
    Wd1, bd1 = dense(ks[2], hidden_dim, hidden_dim)
    Wd2, bd2 = dense(ks[3], hidden_dim, out_dim)
    wc, bc = [], []
    for l in range(num_layers):
        w, b = dense(ks[4 + l], hidden_dim, hidden_dim)
        wc.append(w)
        bc.append(b)
    return dict(
        We1=We1, be1=be1, We2=We2, be2=be2,
        Wc=jnp.stack(wc), bc=jnp.stack(bc),      # (num_layers, H, H), (num_layers, 1, H)
        Wd1=Wd1, bd1=bd1, Wd2=Wd2, bd2=bd2,
    )


# ----------------------------------------------------------------------------
# Pallas kernel: grid over conv layers, persistent h in VMEM scratch
# ----------------------------------------------------------------------------
def gcn_forward_kernel(x_ref, a_ref, we1_ref, be1_ref, we2_ref, be2_ref,
                       wc_ref, bc_ref, wd1_ref, bd1_ref, wd2_ref, bd2_ref,
                       o_ref, h_ref):
    f32 = jnp.float32
    bf16 = jnp.bfloat16
    l = pl.program_id(0)

    def relu(t):
        return jnp.maximum(t, 0.0)

    # ---- initial encoders (first grid step only) ----
    @pl.when(l == 0)
    def _():
        h = relu(jnp.dot(x_ref[...].astype(bf16), we1_ref[...],
                         preferred_element_type=f32) + be1_ref[...])
        h_ref[...] = jnp.dot(h.astype(bf16), we2_ref[...],
                             preferred_element_type=f32) + be2_ref[...]

    # ---- GCNConv layer l: h = relu(A_hat @ (h @ Wc[l]) + bc[l]) ----
    hw = jnp.dot(h_ref[...].astype(bf16), wc_ref[0], preferred_element_type=f32)
    h_new = jnp.dot(a_ref[...], hw.astype(bf16), preferred_element_type=f32) + bc_ref[0]
    h_ref[...] = relu(h_new)
    # TODO(synk): training-mode nn.functional.dropout(p=0.2) uses torch's RNG stream; a
    #             pltpu.prng-based dropout cannot be bit-exact, so eval-mode (identity) is used.

    # ---- decoders (last grid step only) ----
    @pl.when(l == pl.num_programs(0) - 1)
    def _():
        h = relu(jnp.dot(h_ref[...].astype(bf16), wd1_ref[...],
                         preferred_element_type=f32) + bd1_ref[...])
        o_ref[...] = (jnp.dot(h.astype(bf16), wd2_ref[...],
                              preferred_element_type=f32) + bd2_ref[...]).astype(o_ref.dtype)


# ----------------------------------------------------------------------------
# Wrapper
# ----------------------------------------------------------------------------
def variable_layer_gcn_forward(x, pe, edge_index, params, num_layers):
    """x: [N, x_dim], pe: [N, pe_dim], edge_index: [2, E] int32. Returns [N, out_dim]."""
    N = x.shape[0]
    in_dim = params["We1"].shape[0]
    hidden = params["We2"].shape[0]
    out_dim = params["Wd2"].shape[1]
    L = num_layers - 1  # forward iterates over convs[:-1]
    if L < 1:
        # TODO(synk): num_layers=1 (no applied conv layer) would need a conv-free kernel variant.
        raise NotImplementedError("num_layers must be >= 2")

    f32, bf16 = jnp.float32, jnp.bfloat16

    # Graph preprocessing (scatter) + feature concat in the wrapper (no clean Pallas scatter).
    a_hat = build_gcn_norm_adj(edge_index, N)
    h0 = jnp.concatenate([x, pe], axis=-1)  # (N, in_dim)

    # Lane-dense padding: node axis and every feature axis to multiples of 128.
    # (Overhead only matters at toy N; vanishes for realistic graphs N >> 128.)
    Np = _rup(max(N, 8), LANE)
    Dp = _rup(in_dim, LANE)
    Hp = _rup(hidden, LANE)
    Op = _rup(out_dim, LANE)

    # bf16 MXU operands: adjacency + all weights; activations/bias stay f32.
    xp = _pad_to(h0, (Np, Dp))
    ap = _pad_to(a_hat.astype(bf16), (Np, Np))
    we1 = _pad_to(params["We1"].astype(bf16), (Dp, Hp)); be1 = _pad_to(params["be1"], (1, Hp))
    we2 = _pad_to(params["We2"].astype(bf16), (Hp, Hp)); be2 = _pad_to(params["be2"], (1, Hp))
    wc = _pad_to(params["Wc"][:L].astype(bf16), (L, Hp, Hp))
    bc = _pad_to(params["bc"][:L], (L, 1, Hp))
    wd1 = _pad_to(params["Wd1"].astype(bf16), (Hp, Hp)); bd1 = _pad_to(params["bd1"], (1, Hp))
    wd2 = _pad_to(params["Wd2"].astype(bf16), (Hp, Op)); bd2 = _pad_to(params["bd2"], (1, Op))

    inputs = (xp, ap, we1, be1, we2, be2, wc, bc, wd1, bd1, wd2, bd2)

    # VMEM budget from actual resident bytes (conv weights are streamed: only 2 layer blocks live).
    resident_bytes = (
        xp.nbytes + ap.nbytes
        + we1.nbytes + be1.nbytes + we2.nbytes + be2.nbytes
        + 2 * (Hp * Hp * 2 + Hp * 4)        # double-buffered Wc / bc layer blocks
        + wd1.nbytes + bd1.nbytes + wd2.nbytes + bd2.nbytes
        + Np * Hp * 4                        # persistent h scratch
        + 2 * Np * Op * 4                    # output block
    )
    vmem_limit = int(min(max(2 * int(resident_bytes), 8 << 20), _vmem_soft_cap()))

    flops = 2 * Np * (Dp * Hp + Hp * Hp + L * (Hp * Hp + Np * Hp) + Hp * Hp + Hp * Op)
    bytes_accessed = sum(int(a.nbytes) for a in inputs) + Np * Op * 4
    cost = pl.CostEstimate(flops=flops, transcendentals=0, bytes_accessed=bytes_accessed)

    grid_spec = pltpu.PrefetchScalarGridSpec(
        num_scalar_prefetch=0,
        grid=(L,),
        in_specs=[
            pl.BlockSpec((Np, Dp), lambda l: (0, 0)),          # x (resident)
            pl.BlockSpec((Np, Np), lambda l: (0, 0)),          # A_hat bf16 (resident)
            pl.BlockSpec((Dp, Hp), lambda l: (0, 0)),          # We1
            pl.BlockSpec((1, Hp), lambda l: (0, 0)),           # be1
            pl.BlockSpec((Hp, Hp), lambda l: (0, 0)),          # We2
            pl.BlockSpec((1, Hp), lambda l: (0, 0)),           # be2
            pl.BlockSpec((1, Hp, Hp), lambda l: (l, 0, 0)),    # Wc[l]  (streamed / double-buffered)
            pl.BlockSpec((1, 1, Hp), lambda l: (l, 0, 0)),     # bc[l]  (streamed)
            pl.BlockSpec((Hp, Hp), lambda l: (0, 0)),          # Wd1
            pl.BlockSpec((1, Hp), lambda l: (0, 0)),           # bd1
            pl.BlockSpec((Hp, Op), lambda l: (0, 0)),          # Wd2
            pl.BlockSpec((1, Op), lambda l: (0, 0)),           # bd2
        ],
        out_specs=pl.BlockSpec((Np, Op), lambda l: (0, 0)),
        scratch_shapes=[pltpu.VMEM((Np, Hp), f32)],            # persistent hidden state h
    )

    out = pl.pallas_call(
        gcn_forward_kernel,
        out_shape=jax.ShapeDtypeStruct((Np, Op), f32),
        grid_spec=grid_spec,
        compiler_params=pltpu.CompilerParams(
            dimension_semantics=("arbitrary",),               # layers are sequentially dependent
            vmem_limit_bytes=vmem_limit,
        ),
        cost_estimate=cost,
    )(*inputs)

    return out[:N, :out_dim]


# ----------------------------------------------------------------------------
# Pure-JAX reference (eval-mode forward, f32 HIGHEST precision)
# ----------------------------------------------------------------------------
def gcn_reference(x, pe, a_hat, p, num_layers):
    hp = jax.lax.Precision.HIGHEST
    h = jnp.concatenate([x, pe], axis=-1)
    h = jax.nn.relu(jnp.dot(h, p["We1"], precision=hp) + p["be1"])
    h = jnp.dot(h, p["We2"], precision=hp) + p["be2"]
    for l in range(num_layers - 1):
        h = jnp.dot(a_hat, jnp.dot(h, p["Wc"][l], precision=hp), precision=hp) + p["bc"][l]
        h = jax.nn.relu(h)
    h = jax.nn.relu(jnp.dot(h, p["Wd1"], precision=hp) + p["bd1"])
    h = jnp.dot(h, p["Wd2"], precision=hp) + p["bd2"]
    return h


# ----------------------------------------------------------------------------
# Main
# ----------------------------------------------------------------------------
if __name__ == "__main__":
    N = 16              # nodes
    x_dim, pe_dim = 4, 8
    hidden_dim = 32
    out_dim = 16
    num_layers = 4      # -> 3 GCNConv layers actually applied (convs[:-1])

    key = jax.random.PRNGKey(0)
    k_x, k_pe, k_w = jax.random.split(key, 3)
    x = jax.random.normal(k_x, (N, x_dim), dtype=jnp.float32)
    pe_feat = jax.random.normal(k_pe, (N, pe_dim), dtype=jnp.float32)

    # deterministic undirected ring graph
    src = jnp.arange(N, dtype=jnp.int32)
    dst = (src + 1) % N
    edge_index = jnp.stack(
        [jnp.concatenate([src, dst]), jnp.concatenate([dst, src])], axis=0
    )  # (2, 2N)

    params = init_params(k_w, x_dim + pe_dim, hidden_dim, out_dim, num_layers)

    out = variable_layer_gcn_forward(x, pe_feat, edge_index, params, num_layers)
    out = jax.block_until_ready(out)

    a_hat = build_gcn_norm_adj(edge_index, N)
    ref = gcn_reference(x, pe_feat, a_hat, params, num_layers)

    assert out.shape == (N, out_dim)
    # bf16 MXU operands (A_hat + weights) -> tolerance loosened vs the f32-HIGHEST reference.
    max_err = jnp.max(jnp.abs(out - ref))
    assert jnp.allclose(out, ref, atol=5e-2, rtol=5e-2), f"mismatch vs reference, max abs err={max_err}"

    print("KERNEL_OK")
</pallas_src>

<mosaic_0001>
module attributes {stable_mosaic.version = 11 : i64} {
  func.func @gcn_forward_kernel(%arg0: i32, %arg1: memref<128x128xf32, #tpu.memory_space<vmem>>, %arg2: memref<128x128xbf16, #tpu.memory_space<vmem>>, %arg3: memref<128x128xbf16, #tpu.memory_space<vmem>>, %arg4: memref<1x128xf32, #tpu.memory_space<vmem>>, %arg5: memref<128x128xbf16, #tpu.memory_space<vmem>>, %arg6: memref<1x128xf32, #tpu.memory_space<vmem>>, %arg7: memref<1x128x128xbf16, #tpu.memory_space<vmem>>, %arg8: memref<1x1x128xf32, #tpu.memory_space<vmem>>, %arg9: memref<128x128xbf16, #tpu.memory_space<vmem>>, %arg10: memref<1x128xf32, #tpu.memory_space<vmem>>, %arg11: memref<128x128xbf16, #tpu.memory_space<vmem>>, %arg12: memref<1x128xf32, #tpu.memory_space<vmem>>, %arg13: memref<128x128xf32, #tpu.memory_space<vmem>>, %arg14: memref<128x128xf32, #tpu.memory_space<vmem>>) attributes {dimension_semantics = [#tpu.dimension_semantics<arbitrary>], iteration_bounds = array<i64: 3>, scalar_prefetch = 0 : i64, scratch_operands = 1 : i64, tpu.core_type = #tpu.core_type<tc>, window_params = [{pipeline_mode = #tpu.pipeline_mode<synchronous>, transform_indices = @transform_0, window_bounds = array<i64: 128, 128>}, {pipeline_mode = #tpu.pipeline_mode<synchronous>, transform_indices = @transform_1, window_bounds = array<i64: 128, 128>}, {pipeline_mode = #tpu.pipeline_mode<synchronous>, transform_indices = @transform_2, window_bounds = array<i64: 128, 128>}, {pipeline_mode = #tpu.pipeline_mode<synchronous>, transform_indices = @transform_3, window_bounds = array<i64: 1, 128>}, {pipeline_mode = #tpu.pipeline_mode<synchronous>, transform_indices = @transform_4, window_bounds = array<i64: 128, 128>}, {pipeline_mode = #tpu.pipeline_mode<synchronous>, transform_indices = @transform_5, window_bounds = array<i64: 1, 128>}, {transform_indices = @transform_6, window_bounds = array<i64: 1, 128, 128>}, {transform_indices = @transform_7, window_bounds = array<i64: 1, 1, 128>}, {pipeline_mode = #tpu.pipeline_mode<synchronous>, transform_indices = @transform_8, window_bounds = array<i64: 128, 128>}, {pipeline_mode = #tpu.pipeline_mode<synchronous>, transform_indices = @transform_9, window_bounds = array<i64: 1, 128>}, {pipeline_mode = #tpu.pipeline_mode<synchronous>, transform_indices = @transform_10, window_bounds = array<i64: 128, 128>}, {pipeline_mode = #tpu.pipeline_mode<synchronous>, transform_indices = @transform_11, window_bounds = array<i64: 1, 128>}, {pipeline_mode = #tpu.pipeline_mode<synchronous>, transform_indices = @transform_12, window_bounds = array<i64: 128, 128>}]} {
    %c0_i32 = arith.constant 0 : i32
    %0 = arith.cmpi eq, %arg0, %c0_i32 : i32
    %1 = arith.extui %0 : i1 to i32
    %c0_i32_0 = arith.constant 0 : i32
    %2 = arith.cmpi ne, %1, %c0_i32_0 : i32
    scf.if %2 {
      %c0_15 = arith.constant 0 : index
      %c0_16 = arith.constant 0 : index
      %21 = vector.load %arg1[%c0_15, %c0_16] : memref<128x128xf32, #tpu.memory_space<vmem>>, vector<128x128xf32>
      %22 = arith.truncf %21 : vector<128x128xf32> to vector<128x128xbf16>
      %c0_17 = arith.constant 0 : index
      %c0_18 = arith.constant 0 : index
      %23 = vector.load %arg3[%c0_17, %c0_18] : memref<128x128xbf16, #tpu.memory_space<vmem>>, vector<128x128xbf16>
      %cst_19 = arith.constant dense<0.000000e+00> : vector<128x128xf32>
      %24 = tpu.matmul %22, %23, %cst_19 {dimension_numbers = #tpu.dot_dimension_numbers<[1], [0], [0], [1], [0, 0, 1, 1], [], []>} : vector<128x128xbf16>, vector<128x128xbf16>, vector<128x128xf32> -> vector<128x128xf32>
      %c0_20 = arith.constant 0 : index
      %c0_21 = arith.constant 0 : index
      %25 = vector.load %arg4[%c0_20, %c0_21] : memref<1x128xf32, #tpu.memory_space<vmem>>, vector<1x128xf32>
      %26 = vector.broadcast %25 : vector<1x128xf32> to vector<128x128xf32>
      %27 = arith.addf %24, %26 : vector<128x128xf32>
      %cst_22 = arith.constant 0.000000e+00 : f32
      %28 = vector.broadcast %cst_22 : f32 to vector<128x128xf32>
      %29 = arith.maximumf %27, %28 : vector<128x128xf32>
      %30 = arith.truncf %29 : vector<128x128xf32> to vector<128x128xbf16>
      %c0_23 = arith.constant 0 : index
      %c0_24 = arith.constant 0 : index
      %31 = vector.load %arg5[%c0_23, %c0_24] : memref<128x128xbf16, #tpu.memory_space<vmem>>, vector<128x128xbf16>
      %cst_25 = arith.constant dense<0.000000e+00> : vector<128x128xf32>
      %32 = tpu.matmul %30, %31, %cst_25 {dimension_numbers = #tpu.dot_dimension_numbers<[1], [0], [0], [1], [0, 0, 1, 1], [], []>} : vector<128x128xbf16>, vector<128x128xbf16>, vector<128x128xf32> -> vector<128x128xf32>
      %c0_26 = arith.constant 0 : index
      %c0_27 = arith.constant 0 : index
      %33 = vector.load %arg6[%c0_26, %c0_27] : memref<1x128xf32, #tpu.memory_space<vmem>>, vector<1x128xf32>
      %34 = vector.broadcast %33 : vector<1x128xf32> to vector<128x128xf32>
      %35 = arith.addf %32, %34 : vector<128x128xf32>
      %c0_28 = arith.constant 0 : index
      %c0_29 = arith.constant 0 : index
      %36 = vector.load %arg14[%c0_28, %c0_29] : memref<128x128xf32, #tpu.memory_space<vmem>>, vector<128x128xf32>
      tpu.vector_store %arg14[%c0_28, %c0_29], %35 {strides = array<i32>} : memref<128x128xf32, #tpu.memory_space<vmem>>, vector<128x128xf32>,
    } else {
    }
    %c0 = arith.constant 0 : index
    %c0_1 = arith.constant 0 : index
    %3 = vector.load %arg14[%c0, %c0_1] : memref<128x128xf32, #tpu.memory_space<vmem>>, vector<128x128xf32>
    %4 = arith.truncf %3 : vector<128x128xf32> to vector<128x128xbf16>
    %c0_2 = arith.constant 0 : index
    %c0_3 = arith.constant 0 : index
    %c0_4 = arith.constant 0 : index
    %5 = vector.load %arg7[%c0_2, %c0_3, %c0_4] : memref<1x128x128xbf16, #tpu.memory_space<vmem>>, vector<1x128x128xbf16>
    %6 = vector.shape_cast %5 : vector<1x128x128xbf16> to vector<128x128xbf16>
    %cst = arith.constant dense<0.000000e+00> : vector<128x128xf32>
    %7 = tpu.matmul %4, %6, %cst {dimension_numbers = #tpu.dot_dimension_numbers<[1], [0], [0], [1], [0, 0, 1, 1], [], []>} : vector<128x128xbf16>, vector<128x128xbf16>, vector<128x128xf32> -> vector<128x128xf32>
    %c0_5 = arith.constant 0 : index
    %c0_6 = arith.constant 0 : index
    %8 = vector.load %arg2[%c0_5, %c0_6] : memref<128x128xbf16, #tpu.memory_space<vmem>>, vector<128x128xbf16>
    %9 = arith.truncf %7 : vector<128x128xf32> to vector<128x128xbf16>
    %cst_7 = arith.constant dense<0.000000e+00> : vector<128x128xf32>
    %10 = tpu.matmul %8, %9, %cst_7 {dimension_numbers = #tpu.dot_dimension_numbers<[1], [0], [0], [1], [0, 0, 1, 1], [], []>} : vector<128x128xbf16>, vector<128x128xbf16>, vector<128x128xf32> -> vector<128x128xf32>
    %c0_8 = arith.constant 0 : index
    %c0_9 = arith.constant 0 : index
    %c0_10 = arith.constant 0 : index
    %11 = vector.load %arg8[%c0_8, %c0_9, %c0_10] : memref<1x1x128xf32, #tpu.memory_space<vmem>>, vector<1x1x128xf32>
    %12 = vector.shape_cast %11 : vector<1x1x128xf32> to vector<1x128xf32>
    %13 = vector.broadcast %12 : vector<1x128xf32> to vector<128x128xf32>
    %14 = arith.addf %10, %13 : vector<128x128xf32>
    %cst_11 = arith.constant 0.000000e+00 : f32
    %15 = vector.broadcast %cst_11 : f32 to vector<128x128xf32>
    %16 = arith.maximumf %14, %15 : vector<128x128xf32>
    %c0_12 = arith.constant 0 : index
    %c0_13 = arith.constant 0 : index
    %17 = vector.load %arg14[%c0_12, %c0_13] : memref<128x128xf32, #tpu.memory_space<vmem>>, vector<128x128xf32>
    tpu.vector_store %arg14[%c0_12, %c0_13], %16 {strides = array<i32>} : memref<128x128xf32, #tpu.memory_space<vmem>>, vector<128x128xf32>,
    %c2_i32 = arith.constant 2 : i32
    %18 = arith.cmpi eq, %arg0, %c2_i32 : i32
    %19 = arith.extui %18 : i1 to i32
    %c0_i32_14 = arith.constant 0 : i32
    %20 = arith.cmpi ne, %19, %c0_i32_14 : i32
    scf.if %20 {
      %c0_15 = arith.constant 0 : index
      %c0_16 = arith.constant 0 : index
      %21 = vector.load %arg14[%c0_15, %c0_16] : memref<128x128xf32, #tpu.memory_space<vmem>>, vector<128x128xf32>
      %22 = arith.truncf %21 : vector<128x128xf32> to vector<128x128xbf16>
      %c0_17 = arith.constant 0 : index
      %c0_18 = arith.constant 0 : index
      %23 = vector.load %arg9[%c0_17, %c0_18] : memref<128x128xbf16, #tpu.memory_space<vmem>>, vector<128x128xbf16>
      %cst_19 = arith.constant dense<0.000000e+00> : vector<128x128xf32>
      %24 = tpu.matmul %22, %23, %cst_19 {dimension_numbers = #tpu.dot_dimension_numbers<[1], [0], [0], [1], [0, 0, 1, 1], [], []>} : vector<128x128xbf16>, vector<128x128xbf16>, vector<128x128xf32> -> vector<128x128xf32>
      %c0_20 = arith.constant 0 : index
      %c0_21 = arith.constant 0 : index
      %25 = vector.load %arg10[%c0_20, %c0_21] : memref<1x128xf32, #tpu.memory_space<vmem>>, vector<1x128xf32>
      %26 = vector.broadcast %25 : vector<1x128xf32> to vector<128x128xf32>
      %27 = arith.addf %24, %26 : vector<128x128xf32>
      %cst_22 = arith.constant 0.000000e+00 : f32
      %28 = vector.broadcast %cst_22 : f32 to vector<128x128xf32>
      %29 = arith.maximumf %27, %28 : vector<128x128xf32>
      %30 = arith.truncf %29 : vector<128x128xf32> to vector<128x128xbf16>
      %c0_23 = arith.constant 0 : index
      %c0_24 = arith.constant 0 : index
      %31 = vector.load %arg11[%c0_23, %c0_24] : memref<128x128xbf16, #tpu.memory_space<vmem>>, vector<128x128xbf16>
      %cst_25 = arith.constant dense<0.000000e+00> : vector<128x128xf32>
      %32 = tpu.matmul %30, %31, %cst_25 {dimension_numbers = #tpu.dot_dimension_numbers<[1], [0], [0], [1], [0, 0, 1, 1], [], []>} : vector<128x128xbf16>, vector<128x128xbf16>, vector<128x128xf32> -> vector<128x128xf32>
      %c0_26 = arith.constant 0 : index
      %c0_27 = arith.constant 0 : index
      %33 = vector.load %arg12[%c0_26, %c0_27] : memref<1x128xf32, #tpu.memory_space<vmem>>, vector<1x128xf32>
      %34 = vector.broadcast %33 : vector<1x128xf32> to vector<128x128xf32>
      %35 = arith.addf %32, %34 : vector<128x128xf32>
      %c0_28 = arith.constant 0 : index
      %c0_29 = arith.constant 0 : index
      %36 = vector.load %arg13[%c0_28, %c0_29] : memref<128x128xf32, #tpu.memory_space<vmem>>, vector<128x128xf32>
      tpu.vector_store %arg13[%c0_28, %c0_29], %35 {strides = array<i32>} : memref<128x128xf32, #tpu.memory_space<vmem>>, vector<128x128xf32>,
    } else {
    }
    return
  }
  func.func @transform_0(%arg0: i32) -> (i32, i32) {
    %c0_i32 = arith.constant 0 : i32
    %c0_i32_0 = arith.constant 0 : i32
    %c0_i32_1 = arith.constant 0 : i32
    return %c0_i32, %c0_i32_0 : i32, i32
  }
  func.func @transform_1(%arg0: i32) -> (i32, i32) {
    %c0_i32 = arith.constant 0 : i32
    %c0_i32_0 = arith.constant 0 : i32
    %c0_i32_1 = arith.constant 0 : i32
    return %c0_i32, %c0_i32_0 : i32, i32
  }
  func.func @transform_2(%arg0: i32) -> (i32, i32) {
    %c0_i32 = arith.constant 0 : i32
    %c0_i32_0 = arith.constant 0 : i32
    %c0_i32_1 = arith.constant 0 : i32
    return %c0_i32, %c0_i32_0 : i32, i32
  }
  func.func @transform_3(%arg0: i32) -> (i32, i32) {
    %c0_i32 = arith.constant 0 : i32
    %c0_i32_0 = arith.constant 0 : i32
    %c0_i32_1 = arith.constant 0 : i32
    return %c0_i32, %c0_i32_0 : i32, i32
  }
  func.func @transform_4(%arg0: i32) -> (i32, i32) {
    %c0_i32 = arith.constant 0 : i32
    %c0_i32_0 = arith.constant 0 : i32
    %c0_i32_1 = arith.constant 0 : i32
    return %c0_i32, %c0_i32_0 : i32, i32
  }
  func.func @transform_5(%arg0: i32) -> (i32, i32) {
    %c0_i32 = arith.constant 0 : i32
    %c0_i32_0 = arith.constant 0 : i32
    %c0_i32_1 = arith.constant 0 : i32
    return %c0_i32, %c0_i32_0 : i32, i32
  }
  func.func @transform_6(%arg0: i32) -> (i32, i32, i32) {
    %c0_i32 = arith.constant 0 : i32
    %c0_i32_0 = arith.constant 0 : i32
    %c0_i32_1 = arith.constant 0 : i32
    return %arg0, %c0_i32, %c0_i32_0 : i32, i32, i32
  }
  func.func @transform_7(%arg0: i32) -> (i32, i32, i32) {
    %c0_i32 = arith.constant 0 : i32
    %c0_i32_0 = arith.constant 0 : i32
    %c0_i32_1 = arith.constant 0 : i32
    return %arg0, %c0_i32, %c0_i32_0 : i32, i32, i32
  }
  func.func @transform_8(%arg0: i32) -> (i32, i32) {
    %c0_i32 = arith.constant 0 : i32
    %c0_i32_0 = arith.constant 0 : i32
    %c0_i32_1 = arith.constant 0 : i32
    return %c0_i32, %c0_i32_0 : i32, i32
  }
  func.func @transform_9(%arg0: i32) -> (i32, i32) {
    %c0_i32 = arith.constant 0 : i32
    %c0_i32_0 = arith.constant 0 : i32
    %c0_i32_1 = arith.constant 0 : i32
    return %c0_i32, %c0_i32_0 : i32, i32
  }
  func.func @transform_10(%arg0: i32) -> (i32, i32) {
    %c0_i32 = arith.constant 0 : i32
    %c0_i32_0 = arith.constant 0 : i32
    %c0_i32_1 = arith.constant 0 : i32
    return %c0_i32, %c0_i32_0 : i32, i32
  }
  func.func @transform_11(%arg0: i32) -> (i32, i32) {
    %c0_i32 = arith.constant 0 : i32
    %c0_i32_0 = arith.constant 0 : i32
    %c0_i32_1 = arith.constant 0 : i32
    return %c0_i32, %c0_i32_0 : i32, i32
  }
  func.func @transform_12(%arg0: i32) -> (i32, i32) {
    %c0_i32 = arith.constant 0 : i32
    %c0_i32_0 = arith.constant 0 : i32
    %c0_i32_1 = arith.constant 0 : i32
    return %c0_i32, %c0_i32_0 : i32, i32
  }
}

</mosaic_0001>

<bundles_post_ra>
// kernel: tpu_custom_call.1
= control target key start
LH: loop header
LB: loop body
LE: loop exit
PB: predicated region body
PF: predicated region fallthrough
CT: control target
= control target key end

     0   :  { %s2578_s0 = inlined_call_operand.hbm [shape: f32[128,128], index: 0, kind: input, shape index: {}]   ;;  %s2579_s1 = inlined_call_operand.hbm [shape: bf16[128,128], index: 1, kind: input, shape index: {}]   ;;  %s2580_s2 = inlined_call_operand.hbm [shape: bf16[128,128], index: 2, kind: input, shape index: {}]   ;;  %s2581_s3 = inlined_call_operand.vmem [shape: f32[1,128], index: 3, kind: input, shape index: {}]   ;;  %s2582_s4 = inlined_call_operand.hbm [shape: bf16[128,128], index: 4, kind: input, shape index: {}]   ;;  %s2583_s5 = inlined_call_operand.vmem [shape: f32[1,128], index: 5, kind: input, shape index: {}]   ;;  %s2584_s6 = inlined_call_operand.hbm [shape: bf16[3,128,128], index: 6, kind: input, shape index: {}]   ;;  %s2585_s7 = inlined_call_operand.vmem [shape: f32[3,1,128], index: 7, kind: input, shape index: {}]   ;;  %s2586_s8 = inlined_call_operand.hbm [shape: bf16[128,128], index: 8, kind: input, shape index: {}]   ;;  %s2587_s9 = inlined_call_operand.vmem [shape: f32[1,128], index: 9, kind: input, shape index: {}]   ;;  %s2588_s10 = inlined_call_operand.hbm [shape: bf16[128,128], index: 10, kind: input, shape index: {}]   ;;  %s2589_s11 = inlined_call_operand.vmem [shape: f32[1,128], index: 11, kind: input, shape index: {}]   ;;  %s2590_s12 = inlined_call_operand.hbm [shape: f32[128,128], index: 12, kind: output, shape index: {}]  }
   0x1   :  { %2591 = sst [smem:[#allocation22_spill]] %s2578_s0 }
   0x2   :  { %2592 = sst [smem:[#allocation23_spill]] %s2579_s1 }
   0x3   :  { %2593 = sst [smem:[#allocation24_spill]] %s2587_s9 }
   0x4   :  { %2594 = sst [smem:[#allocation25_spill]] %s2589_s11 }
   0x5   :  { %2595 = sst [smem:[#allocation26_spill]] %s2590_s12 }
   0x6   :  { %17 = vsyncpa [#allocation4], 0 }
   0x7   :  { %18 = vsyncpa [#allocation7], 0 }
   0x8   :  { %19 = vsyncpa [#allocation10], 0 }
   0x9   :  { %20 = vsyncpa [#allocation5], 0  ;;  %s2365_s21 = smov 0   ;;  %s2367_s22 = smov 0  }
   0xa   :  { %s2369_s23 = smov 0   ;;  %s2371_s24 = smov 0  }
   0xb LB: > { %s2596_s1 = sld [smem:[#allocation23_spill]]  ;;  %s2389_s28 = sadd.s32 4294967295, %s2285_s24   ;;  %s2285_s24 = sphi %s2371_s24, %s2608_s24   ;;  %s2281_s23 = sphi %s2369_s23, %s2607_s23   ;;  %s2277_s22 = sphi %s2367_s22, %s2606_s22   ;;  %s2273_s21 = sphi %s2365_s21, %s2605_s21  }
   0xc   : > { %p1557_p0 = scmp.ge.s32.totalorder %s2285_s24, 1  ;;  %p173_p1 = scmp.eq.s32.totalorder %s2389_s28, 0 }
   0xd   : > { %p314_p2 = scmp.lt.s32.totalorder %s2285_s24, 4  ;;  %p1558_p3 = scmp.ne.s32.totalorder %s2389_s28, 0 }
   0xe   : > { %s2287_s30 = smov [#allocation6]   ;;  %s2598_s0 = sld [smem:[#allocation22_spill]] }
   0xf   : > { %p2395_p4 = pnand %p1557_p0, %p314_p2  ;;  %s341_s13 = sshll.u32 %s2287_s30, 4  ;;  %s342_s13 = int_to_ptr.vmem [resolvable:$true] %s341_s13 }
  0x10   : > { %s2288_s18 = smov [#allocation3]   ;;  %s2289_s20 = smov 64  }
  0x11   : > { %s339_s27 = sshll.u32 %s2596_s1, 4  ;;  %p1901_p5 = pneg %p2395_p4  ;;  %s340_s27 = int_to_ptr.hbm [resolvable:$true] %s339_s27 }
  0x12   : > { %s327_s19 = sshll.u32 %s2288_s18, 4  ;;  %s2290_s25 = smov 4   ;;  %s328_s19 = int_to_ptr.vmem [resolvable:$true] %s327_s19 }
  0x13   : > { %p2406_p6 = pnand %p1901_p5, %p173_p1  ;;  %s2291_s26 = smov 128  }
  0x14   : > { %s325_s16 = sshll.u32 %s2598_s0, 4  ;;  %s2292_s30 = smov 8   ;;  %s326_s16 = int_to_ptr.hbm [resolvable:$true] %s325_s16 }
  0x15   : > { %1907 = dma.hbm_to_vmem [thread:$0]  (!%p2406_p6), %s340_s27, 1024, %s342_s13, [#allocation7], %s2289_s20, %s2289_s20, %s2290_s25  }
  0x16   : > { %1904 = dma.hbm_to_vmem [thread:$0]  (!%p2406_p6), %s326_s16, 2048, %s328_s19, [#allocation4], %s2291_s26, %s2291_s26, %s2292_s30  }
  0x17   : > { %s353_s0 = sshll.u32 %s2580_s2, 4  ;;  %s2293_s1 = smov [#allocation8]   ;;  %s354_s0 = int_to_ptr.hbm [resolvable:$true] %s353_s0 }
  0x18   : > { %s355_s18 = sshll.u32 %s2293_s1, 4  ;;  %s370_s9 = sshll.u32 %s2582_s4, 4  ;;  %s356_s18 = int_to_ptr.vmem [resolvable:$true] %s355_s18  ;;  %s371_s9 = int_to_ptr.hbm [resolvable:$true] %s370_s9 }
  0x19   : > { %1910 = dma.hbm_to_vmem [thread:$0]  (!%p2406_p6), %s354_s0, 1024, %s356_s18, [#allocation7], %s2289_s20, %s2289_s20, %s2290_s25  }
  0x1a   : > { %s2294_s27 = smov [#allocation9]   ;;  %s387_s1 = sshll.u32 %s2586_s8, 4  ;;  %s388_s1 = int_to_ptr.hbm [resolvable:$true] %s387_s1 }
  0x1b   : > { %s372_s13 = sshll.u32 %s2294_s27, 4  ;;  %s404_s12 = sshll.u32 %s2588_s10, 4  ;;  %s373_s13 = int_to_ptr.vmem [resolvable:$true] %s372_s13  ;;  %s405_s12 = int_to_ptr.hbm [resolvable:$true] %s404_s12 }
  0x1c   : > { %1913 = dma.hbm_to_vmem [thread:$0]  (!%p2406_p6), %s371_s9, 1024, %s373_s13, [#allocation10], %s2289_s20, %s2289_s20, %s2290_s25  }
  0x1d   : > { %s2295_s26 = smov [#allocation12]   ;;  %s2296_s9 = smov [#allocation13]  }
  0x1e   : > { %s389_s30 = sshll.u32 %s2295_s26, 4  ;;  %s406_s14 = sshll.u32 %s2296_s9, 4  ;;  %s390_s30 = int_to_ptr.vmem [resolvable:$true] %s389_s30  ;;  %s407_s14 = int_to_ptr.vmem [resolvable:$true] %s406_s14 }
  0x1f   : > { %1916 = dma.hbm_to_vmem [thread:$0]  (!%p2406_p6), %s388_s1, 1024, %s390_s30, [#allocation7], %s2289_s20, %s2289_s20, %s2290_s25  }
  0x20   : > { %1919 = dma.hbm_to_vmem [thread:$0]  (!%p2406_p6), %s405_s12, 1024, %s407_s14, [#allocation10], %s2289_s20, %s2289_s20, %s2290_s25  }
  0x21   : > { %s2450_s15 = sadd.s32 1, %s2285_s24   ;;  %s159_s18 = sadd.s32 1, %s2281_s23 }
  0x22   : > { %s156_s27 = ssub.s32 %s2285_s24, %s2450_s15  ;;  %p166_p7 = scmp.ne.s32.totalorder %s2281_s23, %s2277_s22 }
  0x23   : > { %p157_p8 = scmp.eq.s32.totalorder %s156_s27, 0  ;;  %p167_p9 = scmp.eq.s32.totalorder %s2285_s24, 0 }
  0x24   : > { %p172_p10 = scmp.ne.s32.totalorder %s2277_s22, %s2273_s21  ;;  %p1930_p11 = scmp.lt.s32.totalorder %s2285_s24, 3 }
  0x25   : > { %s2462_s13 = scalar_select %p157_p8, %s2281_s23, %s159_s18  }
  0x26   : > { %p168_p12 = por %p167_p9, %p166_p7  ;;  %p2466_p13 = por %p173_p1, %p172_p10 }
  0x27   : > { %s423_s16 = sand.u32 1, %s2285_s24   ;;  %s425_s19 = sand.u32 1, %s2281_s23  }
  0x28   : > { %s1565_s1 = sshll.u32 %s425_s19, 6  ;;  %s1774_s0 = sshll.u32 %s2285_s24, 6 }
  0x29   : > { %s432_s26 = scalar_lea.hbm %s2584_s6, %s1774_s0  ;;  %s427_s30 = scalar_lea.vmem [#allocation11], %s1565_s1 }
  0x2a   : > { %s435_s9 = sshll.u32 %s427_s30, 4  ;;  %s433_s21 = sshll.u32 %s432_s26, 4  ;;  %s436_s9 = int_to_ptr.vmem [resolvable:$true] %s435_s9  ;;  %s434_s21 = int_to_ptr.hbm [resolvable:$true] %s433_s21 }
  0x2b   : > { %p2478_p0 = pnand %p1930_p11, %p168_p12  ;;  %s424_s18 = scalar_lea.sflag [#allocation4], %s423_s16 }
  0x2c   : > { %s2169_s27 = sshra.s32 %s434_s21, 4  ;;  %s2176_s11 = scalar_lea.hbm %s2584_s6, 192  ;;  %s2170_s27 = int_to_ptr.hbm [resolvable:$true] %s2169_s27 }
  0x2d   : > { %s2171_s19 = scalar_lea.hbm %s2170_s27, 64  ;;  %p2173_p5 = pneg %p2478_p0 }
  0x2e   : > { %p2172_p2 = scmp.ne.s32.totalorder %s2170_s27, %s2171_s19  ;;  %p2177_p8 = scmp.lt.s32.totalorder %s2170_s27, %s2584_s6 }
  0x2f   : > { %p2178_p9 = scmp.lt.s32.totalorder %s2176_s11, %s2171_s19 }
  0x30   : > { %p2174_p6 = pnand %p2173_p5, %p2172_p2 }
  0x31   : > { %p2179_p10 = por %p2178_p9, %p2177_p8 }
  0x32   : > { %p2175_p7 = pneg %p2174_p6 }
  0x34   : > { %p2180_p11 = pnand %p2179_p10, %p2175_p7 }
  0x36   : > { %2183 = shalt.err (!%p2180_p11)
}
  0x37   : > { %1923 = dma.hbm_to_vmem [thread:$0]  (!%p2478_p0), %s434_s21, 1024, %s436_s9, %s424_s18, %s2289_s20, %s2289_s20, %s2290_s25  }
  0x38   : > { %453 = sbr.rel (%p2395_p4) target bundleno = 1274 (0x4fa), region = 68 }
  0x3d   : > { %2244 = dma.done.wait (%p173_p1), [#allocation4], 2048  }
  0x3e   : > { %2246 = vsyncadd (%p173_p1), [#allocation4], 4294965248 }
  0x3f   : > { %2248 = dma.done.wait (%p173_p1), [#allocation7], 2048  }
  0x40   : > { %2250 = vsyncadd (%p173_p1), [#allocation7], 4294965248 }
  0x41   : > { %2252 = dma.done.wait (%p173_p1), [#allocation10], 1024  }
  0x42   : > { %2254 = vsyncadd (%p173_p1), [#allocation10], 4294966272  ;;  %s475_s29 = sand.u32 1, %s2389_s28   ;;  %s477_s20 = sand.u32 1, %s2277_s22  }
  0x43   : > { %s1573_s25 = sshll.u32 %s477_s20, 6  ;;  %s476_s16 = scalar_lea.sflag [#allocation4], %s475_s29 }
  0x44   : > { %s2511_s26 = scalar_lea.vmem [#allocation11], %s1573_s25 }
  0x45   : > { %2256 = dma.done.wait (%p2466_p13), %s476_s16, 1024  }
  0x46   : > { %2258 = vsyncadd (%p2466_p13), %s476_s16, 4294966272 }
  0x47   : > { %2260 = dma.done.wait (%p173_p1), [#allocation7], 1024  }
  0x48   : > { %2262 = vsyncadd (%p173_p1), [#allocation7], 4294966272 }
  0x49   : > { %2264 = dma.done.wait (%p173_p1), [#allocation10], 1024  }
  0x4a   : > { %2266 = vsyncadd (%p173_p1), [#allocation10], 4294966272  ;;  %p529_p4 = scmp.lt.s32.totalorder %s2389_s28, 2  ;;  %535 = sbr.rel (%p1558_p3) target bundleno = 448 (0x1c0), region = 100 }
  0x4c   : > { %s2527_s30 = scalar_select %p529_p4, %s2389_s28, 2 }
  0x4e   : > { %s531_s21 = scalar_lea.vmem %s2585_s7, %s2527_s30 }
  0x4f   : > { %v1782_v0 = vld [vmem:[#allocation8 + $0x38] sm:$0xff]  ;;  %v1781_v1 = vld [vmem:[#allocation8 + $0x30] sm:$0xff]  ;;  %v1780_v2 = vld [vmem:[#allocation8 + $0x28] sm:$0xff] }
  0x50   : > { %628 = vmatpush.bf16.msra.mxu0 %v1782_v0  ;;  %1823 = vmatpush.bf16.msra.mxu2 %v1782_v0  ;;  %v1779_v3 = vld [vmem:[#allocation8 + $0x20] sm:$0xff]  ;;  %v1778_v4 = vld [vmem:[#allocation8 + $0x18] sm:$0xff]  ;;  %v1777_v5 = vld [vmem:[#allocation8 + $0x10] sm:$0xff] }
  0x51   : > { %v1776_v6 = vld [vmem:[#allocation8 + $0x8] sm:$0xff]  ;;  %v1775_v7 = vld [vmem:[#allocation8] sm:$0xff]  ;;  %v538_v14 = vld [vmem:[#allocation3 + $0x10] sm:$0xff] }
  0x52   : > { %v536_v8 = vld [vmem:[#allocation3] sm:$0xff]  ;;  %v537_v9 = vld [vmem:[#allocation3 + $0x8] sm:$0xff]  ;;  %v539_v15 = vld [vmem:[#allocation3 + $0x18] sm:$0xff] }
  0x53   : > { %v544_v10 = vld [vmem:[#allocation3 + $0x40] sm:$0xff]  ;;  %v545_v11 = vld [vmem:[#allocation3 + $0x48] sm:$0xff]  ;;  %v552_v12 = vpack.c.bf16 %v537_v9, %v536_v8  ;;  %v546_v16 = vld [vmem:[#allocation3 + $0x50] sm:$0xff]  ;;  %v553_v18 = vpack.c.bf16 %v539_v15, %v538_v14 }
  0x54   : > { %629 = vmatpush.bf16.msra.mxu0 %v1781_v1  ;;  %1824 = vmatpush.bf16.msra.mxu2 %v1781_v1  ;;  %v556_v13 = vpack.c.bf16 %v545_v11, %v544_v10  ;;  %v547_v17 = vld [vmem:[#allocation3 + $0x58] sm:$0xff]  ;;  %v1789_v21 = vld [vmem:[#allocation9 + $0x30] sm:$0xff]  ;;  %v1788_v22 = vld [vmem:[#allocation9 + $0x28] sm:$0xff] }
  0x55   : > { %v557_v19 = vpack.c.bf16 %v547_v17, %v546_v16  ;;  %v1790_v20 = vld [vmem:[#allocation9 + $0x38] sm:$0xff]  ;;  %v540_v23 = vld [vmem:[#allocation3 + $0x20] sm:$0xff]  ;;  %v541_v24 = vld [vmem:[#allocation3 + $0x28] sm:$0xff] }
  0x56   : > { %769 = vmatpush.bf16.msra.mxu1 %v1790_v20  ;;  %1831 = vmatpush.bf16.msra.mxu3 %v1790_v20  ;;  %v548_v25 = vld [vmem:[#allocation3 + $0x60] sm:$0xff]  ;;  %v549_v26 = vld [vmem:[#allocation3 + $0x68] sm:$0xff]  ;;  %v554_v28 = vpack.c.bf16 %v541_v24, %v540_v23  ;;  %v542_v30 = vld [vmem:[#allocation3 + $0x30] sm:$0xff] }
  0x57   : > { %v1787_v27 = vld [vmem:[#allocation9 + $0x20] sm:$0xff]  ;;  %v558_v29 = vpack.c.bf16 %v549_v26, %v548_v25  ;;  %v543_v31 = vld [vmem:[#allocation3 + $0x38] sm:$0xff]  ;;  %v550_v32 = vld [vmem:[#allocation3 + $0x70] sm:$0xff] }
  0x58   : > { %630 = vmatpush.bf16.msra.mxu0 %v1780_v2  ;;  %1825 = vmatpush.bf16.msra.mxu2 %v1780_v2  ;;  %v551_v33 = vld [vmem:[#allocation3 + $0x78] sm:$0xff]  ;;  %v555_v34 = vpack.c.bf16 %v543_v31, %v542_v30  ;;  %v1785_v37 = vld [vmem:[#allocation9 + $0x10] sm:$0xff]  ;;  %v1784_v38 = vld [vmem:[#allocation9 + $0x8] sm:$0xff] }
  0x59   : > { %v559_v35 = vpack.c.bf16 %v551_v33, %v550_v32  ;;  %v1786_v36 = vld [vmem:[#allocation9 + $0x18] sm:$0xff]  ;;  %v1783_v39 = vld [vmem:[#allocation9] sm:$0xff] }
  0x5a   : > { %770 = vmatpush.bf16.msra.mxu1 %v1789_v21  ;;  %1832 = vmatpush.bf16.msra.mxu3 %v1789_v21  ;;  %v1984_v41 = vld [vmem:[%s2581_s3] ss:$0 sm:$0xff] }
  0x5b   : > { %v1985_v33 = vld [vmem:[%s2583_s5] ss:$0 sm:$0xff] }
  0x5c   : > { %631 = vmatpush.bf16.msra.mxu0 %v1779_v3  ;;  %1826 = vmatpush.bf16.msra.mxu2 %v1779_v3 }
  0x5e   : > { %771 = vmatpush.bf16.msra.mxu1 %v1788_v22  ;;  %1833 = vmatpush.bf16.msra.mxu3 %v1788_v22 }
  0x60   : > { %632 = vmatpush.bf16.msra.mxu0 %v1778_v4  ;;  %1827 = vmatpush.bf16.msra.mxu2 %v1778_v4 }
  0x62   : > { %772 = vmatpush.bf16.msra.mxu1 %v1787_v27  ;;  %1834 = vmatpush.bf16.msra.mxu3 %v1787_v27 }
  0x64   : > { %633 = vmatpush.bf16.msra.mxu0 %v1777_v5  ;;  %1828 = vmatpush.bf16.msra.mxu2 %v1777_v5 }
  0x66   : > { %773 = vmatpush.bf16.msra.mxu1 %v1786_v36  ;;  %1835 = vmatpush.bf16.msra.mxu3 %v1786_v36 }
  0x68   : > { %634 = vmatpush.bf16.msra.mxu0 %v1776_v6  ;;  %1829 = vmatpush.bf16.msra.mxu2 %v1776_v6 }
  0x6a   : > { %774 = vmatpush.bf16.msra.mxu1 %v1785_v37  ;;  %1836 = vmatpush.bf16.msra.mxu3 %v1785_v37 }
  0x6c   : > { %635 = vmatpush.bf16.msra.mxu0 %v1775_v7  ;;  %1830 = vmatpush.bf16.msra.mxu2 %v1775_v7 }
  0x6e   : > { %775 = vmatpush.bf16.msra.mxu1 %v1784_v38  ;;  %1837 = vmatpush.bf16.msra.mxu3 %v1784_v38 }
  0x6f   : > { %636 = vmatmul.bf16.vlgmr.msra.gmra.mxu0 %v552_v12  ;;  %656 = vmatmul.bf16.vlgmr.msra.gmra.mxu2 %v556_v13 }
  0x72   : > { %776 = vmatpush.bf16.msra.mxu1 %v1783_v39  ;;  %1838 = vmatpush.bf16.msra.mxu3 %v1783_v39 }
  0x7f   : > { %641 = vmatmul.bf16.gmra.mxu0 %v553_v18  ;;  %661 = vmatmul.bf16.gmra.mxu2 %v557_v19 }
  0x8f   : > { %646 = vmatmul.bf16.gmra.mxu0 %v554_v28  ;;  %666 = vmatmul.bf16.gmra.mxu2 %v558_v29 }
  0x9f   : > { %651 = vmatmul.bf16.gmra.mxu0 %v555_v34  ;;  %671 = vmatmul.bf16.gmra.mxu2 %v559_v35 }
  0xec   : > { %v637_v40 = vpop.f32.mrf.mxu0 }
  0xed   : > { %v638_v42 = vadd.f32 %v1984_v41, %v637_v40 }
  0xef   : > { %v677_v45 = vmax.f32 %v638_v42, 0.0 }
  0xf2   : > { %v657_v43 = vpop.f32.mrf.mxu2 }
  0xf3   : > { %v658_v48 = vadd.f32 %v1984_v41, %v657_v43 }
  0xf4   : > { %v639_v44 = vpop.f32.mrf.mxu0 }
  0xf5   : > { %v640_v46 = vadd.f32 %v1984_v41, %v639_v44  ;;  %v685_v53 = vmax.f32 %v658_v48, 0.0 }
  0xf7   : > { %v678_v47 = vmax.f32 %v640_v46, 0.0 }
  0xf9   : > { %v693_v49 = vpack.c.bf16 %v678_v47, %v677_v45 }
  0xfa   : > { %v659_v50 = vpop.f32.mrf.mxu2 }
  0xfb   : > { %v660_v51 = vadd.f32 %v1984_v41, %v659_v50  ;;  %777 = vmatmul.bf16.vlgmr.msra.gmra.mxu1 %v693_v49 }
  0xfc   : > { %v642_v52 = vpop.f32.mrf.mxu0 }
  0xfd   : > { %v686_v54 = vmax.f32 %v660_v51, 0.0  ;;  %v643_v56 = vadd.f32 %v1984_v41, %v642_v52 }
  0xff   : > { %v697_v55 = vpack.c.bf16 %v686_v54, %v685_v53  ;;  %v679_v59 = vmax.f32 %v643_v56, 0.0 }
 0x101   : > { %797 = vmatmul.bf16.vlgmr.msra.gmra.mxu3 %v697_v55 }
 0x102   : > { %v662_v57 = vpop.f32.mrf.mxu2 }
 0x103   : > { %v663_v62 = vadd.f32 %v1984_v41, %v662_v57 }
 0x104   : > { %v644_v58 = vpop.f32.mrf.mxu0 }
 0x105   : > { %v645_v60 = vadd.f32 %v1984_v41, %v644_v58  ;;  %v687_v3 = vmax.f32 %v663_v62, 0.0 }
 0x107   : > { %v680_v61 = vmax.f32 %v645_v60, 0.0 }
 0x109   : > { %v694_v63 = vpack.c.bf16 %v680_v61, %v679_v59 }
 0x10a   : > { %v664_v0 = vpop.f32.mrf.mxu2 }
 0x10b   : > { %v665_v1 = vadd.f32 %v1984_v41, %v664_v0  ;;  %782 = vmatmul.bf16.gmra.mxu1 %v694_v63 }
 0x10c   : > { %v647_v2 = vpop.f32.mrf.mxu0 }
 0x10d   : > { %v688_v4 = vmax.f32 %v665_v1, 0.0  ;;  %v648_v6 = vadd.f32 %v1984_v41, %v647_v2 }
 0x10f   : > { %v698_v5 = vpack.c.bf16 %v688_v4, %v687_v3  ;;  %v681_v9 = vmax.f32 %v648_v6, 0.0 }
 0x111   : > { %802 = vmatmul.bf16.gmra.mxu3 %v698_v5 }
 0x112   : > { %v667_v7 = vpop.f32.mrf.mxu2 }
 0x113   : > { %v668_v12 = vadd.f32 %v1984_v41, %v667_v7 }
 0x114   : > { %v649_v8 = vpop.f32.mrf.mxu0 }
 0x115   : > { %v650_v10 = vadd.f32 %v1984_v41, %v649_v8  ;;  %v689_v17 = vmax.f32 %v668_v12, 0.0 }
 0x117   : > { %v682_v11 = vmax.f32 %v650_v10, 0.0 }
 0x119   : > { %v695_v13 = vpack.c.bf16 %v682_v11, %v681_v9 }
 0x11a   : > { %v669_v14 = vpop.f32.mrf.mxu2 }
 0x11b   : > { %v670_v15 = vadd.f32 %v1984_v41, %v669_v14  ;;  %787 = vmatmul.bf16.gmra.mxu1 %v695_v13 }
 0x11c   : > { %v652_v16 = vpop.f32.mrf.mxu0 }
 0x11d   : > { %v690_v18 = vmax.f32 %v670_v15, 0.0  ;;  %v653_v20 = vadd.f32 %v1984_v41, %v652_v16 }
 0x11f   : > { %v699_v19 = vpack.c.bf16 %v690_v18, %v689_v17  ;;  %v683_v23 = vmax.f32 %v653_v20, 0.0 }
 0x121   : > { %807 = vmatmul.bf16.gmra.mxu3 %v699_v19 }
 0x122   : > { %v672_v21 = vpop.f32.mrf.mxu2 }
 0x123   : > { %v673_v26 = vadd.f32 %v1984_v41, %v672_v21 }
 0x124   : > { %v654_v22 = vpop.f32.mrf.mxu0 }
 0x125   : > { %v655_v24 = vadd.f32 %v1984_v41, %v654_v22  ;;  %v691_v30 = vmax.f32 %v673_v26, 0.0 }
 0x127   : > { %v684_v25 = vmax.f32 %v655_v24, 0.0 }
 0x129   : > { %v696_v27 = vpack.c.bf16 %v684_v25, %v683_v23 }
 0x12a   : > { %v674_v28 = vpop.f32.mrf.mxu2 }
 0x12b   : > { %v675_v29 = vadd.f32 %v1984_v41, %v674_v28  ;;  %792 = vmatmul.bf16.gmra.mxu1 %v696_v27 }
 0x12d   : > { %v692_v31 = vmax.f32 %v675_v29, 0.0 }
 0x12f   : > { %v700_v32 = vpack.c.bf16 %v692_v31, %v691_v30 }
 0x131   : > { %812 = vmatmul.bf16.gmra.mxu3 %v700_v32 }
 0x178   : > { %v778_v34 = vpop.f32.mrf.mxu1 }
 0x179   : > { %v779_v35 = vadd.f32 %v1985_v33, %v778_v34 }
 0x17b   : > { %818 = vst [vmem:[#allocation2 + $0x30] sm:$0xff] %v779_v35 }
 0x180   : > { %v780_v36 = vpop.f32.mrf.mxu1 }
 0x181   : > { %v781_v37 = vadd.f32 %v1985_v33, %v780_v36 }
 0x183   : > { %819 = vst [vmem:[#allocation2] sm:$0xff] %v781_v37 }
 0x184   : > { %v798_v38 = vpop.f32.mrf.mxu3 }
 0x185   : > { %v799_v39 = vadd.f32 %v1985_v33, %v798_v38 }
 0x187   : > { %826 = vst [vmem:[#allocation2 + $0x40] sm:$0xff] %v799_v39 }
 0x188   : > { %v783_v40 = vpop.f32.mrf.mxu1 }
 0x189   : > { %v784_v41 = vadd.f32 %v1985_v33, %v783_v40 }
 0x18b   : > { %820 = vst [vmem:[#allocation2 + $0x58] sm:$0xff] %v784_v41 }
 0x18c   : > { %v800_v42 = vpop.f32.mrf.mxu3 }
 0x18d   : > { %v801_v43 = vadd.f32 %v1985_v33, %v800_v42 }
 0x18f   : > { %827 = vst [vmem:[#allocation2 + $0x20] sm:$0xff] %v801_v43 }
 0x190   : > { %v785_v44 = vpop.f32.mrf.mxu1 }
 0x191   : > { %v786_v45 = vadd.f32 %v1985_v33, %v785_v44 }
 0x193   : > { %821 = vst [vmem:[#allocation2 + $0x18] sm:$0xff] %v786_v45 }
 0x194   : > { %v803_v46 = vpop.f32.mrf.mxu3 }
 0x195   : > { %v804_v47 = vadd.f32 %v1985_v33, %v803_v46 }
 0x197   : > { %828 = vst [vmem:[#allocation2 + $0x10] sm:$0xff] %v804_v47 }
 0x198   : > { %v788_v48 = vpop.f32.mrf.mxu1 }
 0x199   : > { %v789_v49 = vadd.f32 %v1985_v33, %v788_v48 }
 0x19b   : > { %822 = vst [vmem:[#allocation2 + $0x50] sm:$0xff] %v789_v49 }
 0x19c   : > { %v805_v50 = vpop.f32.mrf.mxu3 }
 0x19d   : > { %v806_v51 = vadd.f32 %v1985_v33, %v805_v50 }
 0x19f   : > { %829 = vst [vmem:[#allocation2 + $0x38] sm:$0xff] %v806_v51 }
 0x1a0   : > { %v790_v52 = vpop.f32.mrf.mxu1 }
 0x1a1   : > { %v791_v53 = vadd.f32 %v1985_v33, %v790_v52 }
 0x1a3   : > { %823 = vst [vmem:[#allocation2 + $0x68] sm:$0xff] %v791_v53 }
 0x1a4   : > { %v808_v54 = vpop.f32.mrf.mxu3 }
 0x1a5   : > { %v809_v55 = vadd.f32 %v1985_v33, %v808_v54 }
 0x1a7   : > { %830 = vst [vmem:[#allocation2 + $0x60] sm:$0xff] %v809_v55 }
 0x1a8   : > { %v793_v56 = vpop.f32.mrf.mxu1 }
 0x1a9   : > { %v794_v57 = vadd.f32 %v1985_v33, %v793_v56 }
 0x1ab   : > { %824 = vst [vmem:[#allocation2 + $0x8] sm:$0xff] %v794_v57 }
 0x1ac   : > { %v810_v58 = vpop.f32.mrf.mxu3 }
 0x1ad   : > { %v811_v59 = vadd.f32 %v1985_v33, %v810_v58 }
 0x1af   : > { %831 = vst [vmem:[#allocation2 + $0x70] sm:$0xff] %v811_v59 }
 0x1b0   : > { %v795_v60 = vpop.f32.mrf.mxu1 }
 0x1b1   : > { %v796_v61 = vadd.f32 %v1985_v33, %v795_v60 }
 0x1b3   : > { %825 = vst [vmem:[#allocation2 + $0x48] sm:$0xff] %v796_v61 }
 0x1b4   : > { %v813_v62 = vpop.f32.mrf.mxu3 }
 0x1b5   : > { %v814_v63 = vadd.f32 %v1985_v33, %v813_v62 }
 0x1b7   : > { %832 = vst [vmem:[#allocation2 + $0x78] sm:$0xff] %v814_v63 }
 0x1bc   : > { %v815_v0 = vpop.f32.mrf.mxu3 }
 0x1bd   : > { %v816_v1 = vadd.f32 %v1985_v33, %v815_v0 }
 0x1bf   : > { %833 = vst [vmem:[#allocation2 + $0x28] sm:$0xff] %v816_v1 }
 0x1c0 PF: > { %v1798_v2 = vld [vmem:[%s2511_s26 + $0x38] sm:$0xff]  ;;  %v1797_v3 = vld [vmem:[%s2511_s26 + $0x30] sm:$0xff]  ;;  %v1796_v4 = vld [vmem:[%s2511_s26 + $0x28] sm:$0xff]  ;;  %p1705_p1 = scmp.ne.s32.totalorder %s2389_s28, 2 }
 0x1c1   : > { %1839 = vmatpush.bf16.msra.mxu2 %v1798_v2  ;;  %922 = vmatpush.bf16.msra.mxu0 %v1798_v2  ;;  %v1795_v5 = vld [vmem:[%s2511_s26 + $0x20] sm:$0xff]  ;;  %v1794_v6 = vld [vmem:[%s2511_s26 + $0x18] sm:$0xff]  ;;  %v1793_v7 = vld [vmem:[%s2511_s26 + $0x10] sm:$0xff]  ;;  %s2602_s24 = sld [smem:[#allocation24_spill]] (!%p1705_p1) }
 0x1c2   : > { %v1792_v8 = vld [vmem:[%s2511_s26 + $0x8] sm:$0xff]  ;;  %v1791_v9 = vld [vmem:[%s2511_s26] sm:$0xff]  ;;  %v834_v12 = vld [vmem:[#allocation2 + $0x30] sm:$0xff]  ;;  %s2603_s25 = sld [smem:[#allocation25_spill]] (!%p1705_p1) }
 0x1c3   : > { %v842_v10 = vld [vmem:[#allocation2 + $0x40] sm:$0xff]  ;;  %v844_v16 = vld [vmem:[#allocation2 + $0x10] sm:$0xff]  ;;  %v845_v17 = vld [vmem:[#allocation2 + $0x38] sm:$0xff] }
 0x1c4   : > { %v843_v11 = vld [vmem:[#allocation2 + $0x20] sm:$0xff]  ;;  %v836_v18 = vld [vmem:[#allocation2 + $0x58] sm:$0xff]  ;;  %v855_v20 = vpack.c.bf16 %v845_v17, %v844_v16  ;;  %v847_v23 = vld [vmem:[#allocation2 + $0x70] sm:$0xff] }
 0x1c5   : > { %1840 = vmatpush.bf16.msra.mxu2 %v1797_v3  ;;  %923 = vmatpush.bf16.msra.mxu0 %v1797_v3  ;;  %v835_v13 = vld [vmem:[#allocation2] sm:$0xff]  ;;  %v854_v14 = vpack.c.bf16 %v843_v11, %v842_v10  ;;  %v837_v19 = vld [vmem:[#allocation2 + $0x18] sm:$0xff]  ;;  %v838_v24 = vld [vmem:[#allocation2 + $0x50] sm:$0xff] }
 0x1c6   : > { %v850_v15 = vpack.c.bf16 %v835_v13, %v834_v12  ;;  %v851_v21 = vpack.c.bf16 %v837_v19, %v836_v18  ;;  %v846_v22 = vld [vmem:[#allocation2 + $0x60] sm:$0xff]  ;;  %v839_v25 = vld [vmem:[#allocation2 + $0x68] sm:$0xff]  ;;  %v848_v28 = vld [vmem:[#allocation2 + $0x78] sm:$0xff] }
 0x1c7   : > { %v856_v26 = vpack.c.bf16 %v847_v23, %v846_v22  ;;  %v852_v27 = vpack.c.bf16 %v839_v25, %v838_v24  ;;  %v849_v29 = vld [vmem:[#allocation2 + $0x28] sm:$0xff]  ;;  %v1799_v58 = vld [vmem:[#allocation6] sm:$0xff]  ;;  %v1801_v62 = vld [vmem:[#allocation6 + $0x10] sm:$0xff] }
 0x1c8   : > { %v840_v30 = vld [vmem:[#allocation2 + $0x8] sm:$0xff]  ;;  %v857_v32 = vpack.c.bf16 %v849_v29, %v848_v28  ;;  %v1803_v59 = vld [vmem:[#allocation6 + $0x20] sm:$0xff]  ;;  %v1805_v63 = vld [vmem:[#allocation6 + $0x30] sm:$0xff] }
 0x1c9   : > { %1841 = vmatpush.bf16.msra.mxu2 %v1796_v4  ;;  %924 = vmatpush.bf16.msra.mxu0 %v1796_v4  ;;  %v841_v31 = vld [vmem:[#allocation2 + $0x48] sm:$0xff]  ;;  %v1802_v0 = vld [vmem:[#allocation6 + $0x18] sm:$0xff]  ;;  %v1986_v2 = vld [vmem:[%s531_s21] ss:$0 sm:$0xff] }
 0x1ca   : > { %v853_v33 = vpack.c.bf16 %v841_v31, %v840_v30  ;;  %v1800_v60 = vld [vmem:[#allocation6 + $0x8] sm:$0xff]  ;;  %v1806_v1 = vld [vmem:[#allocation6 + $0x38] sm:$0xff] }
 0x1cb   : > { %v1804_v61 = vld [vmem:[#allocation6 + $0x28] sm:$0xff] }
 0x1cd   : > { %1842 = vmatpush.bf16.msra.mxu2 %v1795_v5  ;;  %925 = vmatpush.bf16.msra.mxu0 %v1795_v5 }
 0x1d1   : > { %1843 = vmatpush.bf16.msra.mxu2 %v1794_v6  ;;  %926 = vmatpush.bf16.msra.mxu0 %v1794_v6 }
 0x1d5   : > { %1844 = vmatpush.bf16.msra.mxu2 %v1793_v7  ;;  %927 = vmatpush.bf16.msra.mxu0 %v1793_v7 }
 0x1d9   : > { %1845 = vmatpush.bf16.msra.mxu2 %v1792_v8  ;;  %928 = vmatpush.bf16.msra.mxu0 %v1792_v8 }
 0x1dd   : > { %1846 = vmatpush.bf16.msra.mxu2 %v1791_v9  ;;  %929 = vmatpush.bf16.msra.mxu0 %v1791_v9 }
 0x1e0   : > { %950 = vmatmul.bf16.vlgmr.msra.gmra.mxu2 %v854_v14  ;;  %930 = vmatmul.bf16.vlgmr.msra.gmra.mxu0 %v850_v15 }
 0x1f0   : > { %955 = vmatmul.bf16.gmra.mxu2 %v855_v20  ;;  %935 = vmatmul.bf16.gmra.mxu0 %v851_v21 }
 0x200   : > { %960 = vmatmul.bf16.gmra.mxu2 %v856_v26  ;;  %940 = vmatmul.bf16.gmra.mxu0 %v852_v27 }
 0x210   : > { %965 = vmatmul.bf16.gmra.mxu2 %v857_v32  ;;  %945 = vmatmul.bf16.gmra.mxu0 %v853_v33 }
 0x25d   : > { %v931_v35 = vpop.f32.mrf.mxu0 }
 0x263   : > { %v951_v34 = vpop.f32.mrf.mxu2 }
 0x265   : > { %v933_v37 = vpop.f32.mrf.mxu0 }
 0x266   : > { %v987_v57 = vpack.c.bf16 %v933_v37, %v931_v35 }
 0x26b   : > { %v953_v36 = vpop.f32.mrf.mxu2 }
 0x26c   : > { %v991_v52 = vpack.c.bf16 %v953_v36, %v951_v34 }
 0x26d   : > { %v936_v39 = vpop.f32.mrf.mxu0 }
 0x273   : > { %v956_v38 = vpop.f32.mrf.mxu2 }
 0x275   : > { %v938_v41 = vpop.f32.mrf.mxu0 }
 0x276   : > { %v988_v56 = vpack.c.bf16 %v938_v41, %v936_v39 }
 0x27b   : > { %v958_v40 = vpop.f32.mrf.mxu2 }
 0x27c   : > { %v992_v51 = vpack.c.bf16 %v958_v40, %v956_v38 }
 0x27d   : > { %v941_v43 = vpop.f32.mrf.mxu0 }
 0x283   : > { %v961_v42 = vpop.f32.mrf.mxu2 }
 0x285   : > { %v943_v46 = vpop.f32.mrf.mxu0 }
 0x286   : > { %v989_v55 = vpack.c.bf16 %v943_v46, %v941_v43 }
 0x28b   : > { %v963_v44 = vpop.f32.mrf.mxu2 }
 0x28c   : > { %v993_v50 = vpack.c.bf16 %v963_v44, %v961_v42 }
 0x28d   : > { %v946_v49 = vpop.f32.mrf.mxu0 }
 0x293   : > { %v966_v45 = vpop.f32.mrf.mxu2 }
 0x295   : > { %v948_v53 = vpop.f32.mrf.mxu0 }
 0x296   : > { %v990_v54 = vpack.c.bf16 %v948_v53, %v946_v49 }
 0x29b   : > { %v968_v47 = vpop.f32.mrf.mxu2 }
 0x29c   : > { %v994_v48 = vpack.c.bf16 %v968_v47, %v966_v45 }
 0x29e   : > { %1047 = vmatpush.bf16.msra.mxu1 %v994_v48  ;;  %1847 = vmatpush.bf16.msra.mxu3 %v994_v48 }
 0x2a2   : > { %1048 = vmatpush.bf16.msra.mxu1 %v993_v50  ;;  %1848 = vmatpush.bf16.msra.mxu3 %v993_v50 }
 0x2a6   : > { %1049 = vmatpush.bf16.msra.mxu1 %v992_v51  ;;  %1849 = vmatpush.bf16.msra.mxu3 %v992_v51 }
 0x2aa   : > { %1050 = vmatpush.bf16.msra.mxu1 %v991_v52  ;;  %1850 = vmatpush.bf16.msra.mxu3 %v991_v52 }
 0x2ae   : > { %1051 = vmatpush.bf16.msra.mxu1 %v990_v54  ;;  %1851 = vmatpush.bf16.msra.mxu3 %v990_v54 }
 0x2b2   : > { %1052 = vmatpush.bf16.msra.mxu1 %v989_v55  ;;  %1852 = vmatpush.bf16.msra.mxu3 %v989_v55 }
 0x2b6   : > { %1053 = vmatpush.bf16.msra.mxu1 %v988_v56  ;;  %1853 = vmatpush.bf16.msra.mxu3 %v988_v56 }
 0x2ba   : > { %1054 = vmatpush.bf16.msra.mxu1 %v987_v57  ;;  %1854 = vmatpush.bf16.msra.mxu3 %v987_v57 }
 0x2bd   : > { %1055 = vmatmul.bf16.vlgmr.msra.gmra.mxu1 %v1799_v58  ;;  %1075 = vmatmul.bf16.vlgmr.msra.gmra.mxu3 %v1803_v59 }
 0x2cd   : > { %1060 = vmatmul.bf16.gmra.mxu1 %v1800_v60  ;;  %1080 = vmatmul.bf16.gmra.mxu3 %v1804_v61 }
 0x2dd   : > { %1065 = vmatmul.bf16.gmra.mxu1 %v1801_v62  ;;  %1085 = vmatmul.bf16.gmra.mxu3 %v1805_v63 }
 0x2ed   : > { %1070 = vmatmul.bf16.gmra.mxu1 %v1802_v0  ;;  %1090 = vmatmul.bf16.gmra.mxu3 %v1806_v1 }
 0x33a   : > { %v1056_v3 = vpop.f32.mrf.mxu1 }
 0x33b   : > { %v1057_v4 = vadd.f32 %v1986_v2, %v1056_v3 }
 0x33d   : > { %v1096_v5 = vmax.f32 %v1057_v4, 0.0 }
 0x33f   : > { %1112 = vst [vmem:[#allocation2 + $0x30] sm:$0xff] %v1096_v5 }
 0x340   : > { %v1076_v6 = vpop.f32.mrf.mxu3 }
 0x341   : > { %v1077_v7 = vadd.f32 %v1986_v2, %v1076_v6 }
 0x342   : > { %v1058_v8 = vpop.f32.mrf.mxu1 }
 0x343   : > { %v1104_v9 = vmax.f32 %v1077_v7, 0.0  ;;  %v1059_v10 = vadd.f32 %v1986_v2, %v1058_v8 }
 0x345   : > { %1120 = vst [vmem:[#allocation2 + $0x40] sm:$0xff] %v1104_v9  ;;  %v1097_v11 = vmax.f32 %v1059_v10, 0.0 }
 0x347   : > { %1113 = vst [vmem:[#allocation2] sm:$0xff] %v1097_v11 }
 0x348   : > { %v1078_v12 = vpop.f32.mrf.mxu3 }
 0x349   : > { %v1079_v13 = vadd.f32 %v1986_v2, %v1078_v12 }
 0x34a   : > { %v1061_v14 = vpop.f32.mrf.mxu1 }
 0x34b   : > { %v1105_v15 = vmax.f32 %v1079_v13, 0.0  ;;  %v1062_v16 = vadd.f32 %v1986_v2, %v1061_v14 }
 0x34d   : > { %1121 = vst [vmem:[#allocation2 + $0x20] sm:$0xff] %v1105_v15  ;;  %v1098_v17 = vmax.f32 %v1062_v16, 0.0 }
 0x34f   : > { %1114 = vst [vmem:[#allocation2 + $0x58] sm:$0xff] %v1098_v17 }
 0x350   : > { %v1081_v18 = vpop.f32.mrf.mxu3 }
 0x351   : > { %v1082_v19 = vadd.f32 %v1986_v2, %v1081_v18 }
 0x352   : > { %v1063_v20 = vpop.f32.mrf.mxu1 }
 0x353   : > { %v1106_v21 = vmax.f32 %v1082_v19, 0.0  ;;  %v1064_v22 = vadd.f32 %v1986_v2, %v1063_v20 }
 0x355   : > { %1122 = vst [vmem:[#allocation2 + $0x10] sm:$0xff] %v1106_v21  ;;  %v1099_v23 = vmax.f32 %v1064_v22, 0.0 }
 0x357   : > { %1115 = vst [vmem:[#allocation2 + $0x18] sm:$0xff] %v1099_v23 }
 0x358   : > { %v1083_v24 = vpop.f32.mrf.mxu3 }
 0x359   : > { %v1084_v25 = vadd.f32 %v1986_v2, %v1083_v24 }
 0x35a   : > { %v1066_v26 = vpop.f32.mrf.mxu1 }
 0x35b   : > { %v1107_v27 = vmax.f32 %v1084_v25, 0.0  ;;  %v1067_v28 = vadd.f32 %v1986_v2, %v1066_v26 }
 0x35d   : > { %1123 = vst [vmem:[#allocation2 + $0x38] sm:$0xff] %v1107_v27  ;;  %v1100_v29 = vmax.f32 %v1067_v28, 0.0 }
 0x35f   : > { %1116 = vst [vmem:[#allocation2 + $0x50] sm:$0xff] %v1100_v29 }
 0x360   : > { %v1086_v30 = vpop.f32.mrf.mxu3 }
 0x361   : > { %v1087_v31 = vadd.f32 %v1986_v2, %v1086_v30 }
 0x362   : > { %v1068_v32 = vpop.f32.mrf.mxu1 }
 0x363   : > { %v1108_v33 = vmax.f32 %v1087_v31, 0.0  ;;  %v1069_v34 = vadd.f32 %v1986_v2, %v1068_v32 }
 0x365   : > { %1124 = vst [vmem:[#allocation2 + $0x60] sm:$0xff] %v1108_v33  ;;  %v1101_v35 = vmax.f32 %v1069_v34, 0.0 }
 0x367   : > { %1117 = vst [vmem:[#allocation2 + $0x68] sm:$0xff] %v1101_v35 }
 0x368   : > { %v1088_v36 = vpop.f32.mrf.mxu3 }
 0x369   : > { %v1089_v37 = vadd.f32 %v1986_v2, %v1088_v36 }
 0x36a   : > { %v1071_v38 = vpop.f32.mrf.mxu1 }
 0x36b   : > { %v1109_v39 = vmax.f32 %v1089_v37, 0.0  ;;  %v1072_v40 = vadd.f32 %v1986_v2, %v1071_v38 }
 0x36d   : > { %1125 = vst [vmem:[#allocation2 + $0x70] sm:$0xff] %v1109_v39  ;;  %v1102_v41 = vmax.f32 %v1072_v40, 0.0 }
 0x36f   : > { %1118 = vst [vmem:[#allocation2 + $0x8] sm:$0xff] %v1102_v41 }
 0x370   : > { %v1091_v42 = vpop.f32.mrf.mxu3 }
 0x371   : > { %v1092_v43 = vadd.f32 %v1986_v2, %v1091_v42 }
 0x372   : > { %v1073_v44 = vpop.f32.mrf.mxu1 }
 0x373   : > { %v1110_v45 = vmax.f32 %v1092_v43, 0.0  ;;  %v1074_v46 = vadd.f32 %v1986_v2, %v1073_v44 }
 0x375   : > { %1126 = vst [vmem:[#allocation2 + $0x78] sm:$0xff] %v1110_v45  ;;  %v1103_v47 = vmax.f32 %v1074_v46, 0.0 }
 0x377   : > { %1119 = vst [vmem:[#allocation2 + $0x48] sm:$0xff] %v1103_v47 }
 0x378   : > { %v1093_v48 = vpop.f32.mrf.mxu3 }
 0x379   : > { %v1094_v49 = vadd.f32 %v1986_v2, %v1093_v48  ;;  %1131 = sbr.rel (%p1705_p1) target bundleno = 1263 (0x4ef), region = 104 }
 0x37b   : > { %v1111_v50 = vmax.f32 %v1094_v49, 0.0 }
 0x37d   : > { %1127 = vst [vmem:[#allocation2 + $0x28] sm:$0xff] %v1111_v50 }
 0x37e   : > { %v1814_v51 = vld [vmem:[#allocation12 + $0x38] sm:$0xff]  ;;  %v1813_v52 = vld [vmem:[#allocation12 + $0x30] sm:$0xff]  ;;  %v1812_v53 = vld [vmem:[#allocation12 + $0x28] sm:$0xff] }
 0x37f   : > { %1224 = vmatpush.bf16.msra.mxu0 %v1814_v51  ;;  %1855 = vmatpush.bf16.msra.mxu2 %v1814_v51  ;;  %v1811_v54 = vld [vmem:[#allocation12 + $0x20] sm:$0xff]  ;;  %v1810_v55 = vld [vmem:[#allocation12 + $0x18] sm:$0xff]  ;;  %v1809_v56 = vld [vmem:[#allocation12 + $0x10] sm:$0xff] }
 0x380   : > { %v1808_v57 = vld [vmem:[#allocation12 + $0x8] sm:$0xff]  ;;  %v1807_v58 = vld [vmem:[#allocation12] sm:$0xff]  ;;  %v1132_v59 = vld [vmem:[#allocation2 + $0x30] sm:$0xff] }
 0x381   : > { %v1133_v60 = vld [vmem:[#allocation2] sm:$0xff]  ;;  %v1134_v1 = vld [vmem:[#allocation2 + $0x58] sm:$0xff]  ;;  %v1142_v3 = vld [vmem:[#allocation2 + $0x10] sm:$0xff] }
 0x382   : > { %v1140_v61 = vld [vmem:[#allocation2 + $0x40] sm:$0xff]  ;;  %v1148_v63 = vpack.c.bf16 %v1133_v60, %v1132_v59  ;;  %v1135_v2 = vld [vmem:[#allocation2 + $0x18] sm:$0xff]  ;;  %v1821_v8 = vld [vmem:[#allocation13 + $0x30] sm:$0xff] }
 0x383   : > { %1225 = vmatpush.bf16.msra.mxu0 %v1813_v52  ;;  %1856 = vmatpush.bf16.msra.mxu2 %v1813_v52  ;;  %v1141_v62 = vld [vmem:[#allocation2 + $0x20] sm:$0xff]  ;;  %v1143_v4 = vld [vmem:[#allocation2 + $0x38] sm:$0xff]  ;;  %v1149_v5 = vpack.c.bf16 %v1135_v2, %v1134_v1  ;;  %v1820_v9 = vld [vmem:[#allocation13 + $0x28] sm:$0xff] }
 0x384   : > { %v1152_v0 = vpack.c.bf16 %v1141_v62, %v1140_v61  ;;  %v1153_v6 = vpack.c.bf16 %v1143_v4, %v1142_v3  ;;  %v1822_v7 = vld [vmem:[#allocation13 + $0x38] sm:$0xff]  ;;  %v1136_v10 = vld [vmem:[#allocation2 + $0x50] sm:$0xff]  ;;  %v1137_v11 = vld [vmem:[#allocation2 + $0x68] sm:$0xff] }
 0x385   : > { %1365 = vmatpush.bf16.msra.mxu1 %v1822_v7  ;;  %1863 = vmatpush.bf16.msra.mxu3 %v1822_v7  ;;  %v1144_v12 = vld [vmem:[#allocation2 + $0x60] sm:$0xff]  ;;  %v1145_v13 = vld [vmem:[#allocation2 + $0x70] sm:$0xff]  ;;  %v1150_v15 = vpack.c.bf16 %v1137_v11, %v1136_v10  ;;  %v1138_v17 = vld [vmem:[#allocation2 + $0x8] sm:$0xff] }
 0x386   : > { %v1819_v14 = vld [vmem:[#allocation13 + $0x20] sm:$0xff]  ;;  %v1154_v16 = vpack.c.bf16 %v1145_v13, %v1144_v12  ;;  %v1139_v18 = vld [vmem:[#allocation2 + $0x48] sm:$0xff]  ;;  %v1146_v19 = vld [vmem:[#allocation2 + $0x78] sm:$0xff] }
 0x387   : > { %1226 = vmatpush.bf16.msra.mxu0 %v1812_v53  ;;  %1857 = vmatpush.bf16.msra.mxu2 %v1812_v53  ;;  %v1147_v20 = vld [vmem:[#allocation2 + $0x28] sm:$0xff]  ;;  %v1151_v21 = vpack.c.bf16 %v1139_v18, %v1138_v17  ;;  %v1818_v23 = vld [vmem:[#allocation13 + $0x18] sm:$0xff]  ;;  %v1817_v24 = vld [vmem:[#allocation13 + $0x10] sm:$0xff] }
 0x388   : > { %v1155_v22 = vpack.c.bf16 %v1147_v20, %v1146_v19  ;;  %v1816_v25 = vld [vmem:[#allocation13 + $0x8] sm:$0xff]  ;;  %v1815_v26 = vld [vmem:[#allocation13] sm:$0xff] }
 0x389   : > { %1366 = vmatpush.bf16.msra.mxu1 %v1821_v8  ;;  %1864 = vmatpush.bf16.msra.mxu3 %v1821_v8  ;;  %v1987_v28 = vld [vmem:[%s2602_s24] ss:$0 sm:$0xff] }
 0x38a   : > { %v1988_v20 = vld [vmem:[%s2603_s25] ss:$0 sm:$0xff] }
 0x38b   : > { %1227 = vmatpush.bf16.msra.mxu0 %v1811_v54  ;;  %1858 = vmatpush.bf16.msra.mxu2 %v1811_v54 }
 0x38d   : > { %1367 = vmatpush.bf16.msra.mxu1 %v1820_v9  ;;  %1865 = vmatpush.bf16.msra.mxu3 %v1820_v9 }
 0x38f   : > { %1228 = vmatpush.bf16.msra.mxu0 %v1810_v55  ;;  %1859 = vmatpush.bf16.msra.mxu2 %v1810_v55 }
 0x391   : > { %1368 = vmatpush.bf16.msra.mxu1 %v1819_v14  ;;  %1866 = vmatpush.bf16.msra.mxu3 %v1819_v14 }
 0x393   : > { %1229 = vmatpush.bf16.msra.mxu0 %v1809_v56  ;;  %1860 = vmatpush.bf16.msra.mxu2 %v1809_v56 }
 0x395   : > { %1369 = vmatpush.bf16.msra.mxu1 %v1818_v23  ;;  %1867 = vmatpush.bf16.msra.mxu3 %v1818_v23 }
 0x397   : > { %1230 = vmatpush.bf16.msra.mxu0 %v1808_v57  ;;  %1861 = vmatpush.bf16.msra.mxu2 %v1808_v57 }
 0x399   : > { %1370 = vmatpush.bf16.msra.mxu1 %v1817_v24  ;;  %1868 = vmatpush.bf16.msra.mxu3 %v1817_v24 }
 0x39b   : > { %1231 = vmatpush.bf16.msra.mxu0 %v1807_v58  ;;  %1862 = vmatpush.bf16.msra.mxu2 %v1807_v58 }
 0x39d   : > { %1371 = vmatpush.bf16.msra.mxu1 %v1816_v25  ;;  %1869 = vmatpush.bf16.msra.mxu3 %v1816_v25 }
 0x39e   : > { %1232 = vmatmul.bf16.vlgmr.msra.gmra.mxu0 %v1148_v63  ;;  %1252 = vmatmul.bf16.vlgmr.msra.gmra.mxu2 %v1152_v0 }
 0x3a1   : > { %1372 = vmatpush.bf16.msra.mxu1 %v1815_v26  ;;  %1870 = vmatpush.bf16.msra.mxu3 %v1815_v26 }
 0x3ae   : > { %1237 = vmatmul.bf16.gmra.mxu0 %v1149_v5  ;;  %1257 = vmatmul.bf16.gmra.mxu2 %v1153_v6 }
 0x3be   : > { %1242 = vmatmul.bf16.gmra.mxu0 %v1150_v15  ;;  %1262 = vmatmul.bf16.gmra.mxu2 %v1154_v16 }
 0x3ce   : > { %1247 = vmatmul.bf16.gmra.mxu0 %v1151_v21  ;;  %1267 = vmatmul.bf16.gmra.mxu2 %v1155_v22 }
 0x41b   : > { %v1233_v27 = vpop.f32.mrf.mxu0 }
 0x41c   : > { %v1234_v29 = vadd.f32 %v1987_v28, %v1233_v27 }
 0x41e   : > { %v1273_v32 = vmax.f32 %v1234_v29, 0.0 }
 0x421   : > { %v1253_v30 = vpop.f32.mrf.mxu2 }
 0x422   : > { %v1254_v35 = vadd.f32 %v1987_v28, %v1253_v30 }
 0x423   : > { %v1235_v31 = vpop.f32.mrf.mxu0 }
 0x424   : > { %v1236_v33 = vadd.f32 %v1987_v28, %v1235_v31  ;;  %v1281_v40 = vmax.f32 %v1254_v35, 0.0 }
 0x426   : > { %v1274_v34 = vmax.f32 %v1236_v33, 0.0 }
 0x428   : > { %v1289_v36 = vpack.c.bf16 %v1274_v34, %v1273_v32 }
 0x429   : > { %v1255_v37 = vpop.f32.mrf.mxu2 }
 0x42a   : > { %v1256_v38 = vadd.f32 %v1987_v28, %v1255_v37  ;;  %1373 = vmatmul.bf16.vlgmr.msra.gmra.mxu1 %v1289_v36 }
 0x42b   : > { %v1238_v39 = vpop.f32.mrf.mxu0 }
 0x42c   : > { %v1282_v41 = vmax.f32 %v1256_v38, 0.0  ;;  %v1239_v43 = vadd.f32 %v1987_v28, %v1238_v39 }
 0x42e   : > { %v1293_v42 = vpack.c.bf16 %v1282_v41, %v1281_v40  ;;  %v1275_v46 = vmax.f32 %v1239_v43, 0.0 }
 0x430   : > { %1393 = vmatmul.bf16.vlgmr.msra.gmra.mxu3 %v1293_v42 }
 0x431   : > { %v1258_v44 = vpop.f32.mrf.mxu2 }
 0x432   : > { %v1259_v49 = vadd.f32 %v1987_v28, %v1258_v44 }
 0x433   : > { %v1240_v45 = vpop.f32.mrf.mxu0 }
 0x434   : > { %v1241_v47 = vadd.f32 %v1987_v28, %v1240_v45  ;;  %v1283_v54 = vmax.f32 %v1259_v49, 0.0 }
 0x436   : > { %v1276_v48 = vmax.f32 %v1241_v47, 0.0 }
 0x438   : > { %v1290_v50 = vpack.c.bf16 %v1276_v48, %v1275_v46 }
 0x439   : > { %v1260_v51 = vpop.f32.mrf.mxu2 }
 0x43a   : > { %v1261_v52 = vadd.f32 %v1987_v28, %v1260_v51  ;;  %1378 = vmatmul.bf16.gmra.mxu1 %v1290_v50 }
 0x43b   : > { %v1243_v53 = vpop.f32.mrf.mxu0 }
 0x43c   : > { %v1284_v55 = vmax.f32 %v1261_v52, 0.0  ;;  %v1244_v57 = vadd.f32 %v1987_v28, %v1243_v53 }
 0x43e   : > { %v1294_v56 = vpack.c.bf16 %v1284_v55, %v1283_v54  ;;  %v1277_v60 = vmax.f32 %v1244_v57, 0.0 }
 0x440   : > { %1398 = vmatmul.bf16.gmra.mxu3 %v1294_v56 }
 0x441   : > { %v1263_v58 = vpop.f32.mrf.mxu2 }
 0x442   : > { %v1264_v63 = vadd.f32 %v1987_v28, %v1263_v58 }
 0x443   : > { %v1245_v59 = vpop.f32.mrf.mxu0 }
 0x444   : > { %v1246_v61 = vadd.f32 %v1987_v28, %v1245_v59  ;;  %v1285_v4 = vmax.f32 %v1264_v63, 0.0 }
 0x446   : > { %v1278_v62 = vmax.f32 %v1246_v61, 0.0 }
 0x448   : > { %v1291_v0 = vpack.c.bf16 %v1278_v62, %v1277_v60 }
 0x449   : > { %v1265_v1 = vpop.f32.mrf.mxu2 }
 0x44a   : > { %v1266_v2 = vadd.f32 %v1987_v28, %v1265_v1  ;;  %1383 = vmatmul.bf16.gmra.mxu1 %v1291_v0 }
 0x44b   : > { %v1248_v3 = vpop.f32.mrf.mxu0 }
 0x44c   : > { %v1286_v5 = vmax.f32 %v1266_v2, 0.0  ;;  %v1249_v7 = vadd.f32 %v1987_v28, %v1248_v3 }
 0x44e   : > { %v1295_v6 = vpack.c.bf16 %v1286_v5, %v1285_v4  ;;  %v1279_v10 = vmax.f32 %v1249_v7, 0.0 }
 0x450   : > { %1403 = vmatmul.bf16.gmra.mxu3 %v1295_v6 }
 0x451   : > { %v1268_v8 = vpop.f32.mrf.mxu2 }
 0x452   : > { %v1269_v13 = vadd.f32 %v1987_v28, %v1268_v8 }
 0x453   : > { %v1250_v9 = vpop.f32.mrf.mxu0 }
 0x454   : > { %v1251_v11 = vadd.f32 %v1987_v28, %v1250_v9  ;;  %v1287_v17 = vmax.f32 %v1269_v13, 0.0 }
 0x456   : > { %v1280_v12 = vmax.f32 %v1251_v11, 0.0 }
 0x458   : > { %v1292_v14 = vpack.c.bf16 %v1280_v12, %v1279_v10 }
 0x459   : > { %v1270_v15 = vpop.f32.mrf.mxu2 }
 0x45a   : > { %v1271_v16 = vadd.f32 %v1987_v28, %v1270_v15  ;;  %1388 = vmatmul.bf16.gmra.mxu1 %v1292_v14 }
 0x45c   : > { %v1288_v18 = vmax.f32 %v1271_v16, 0.0 }
 0x45e   : > { %v1296_v19 = vpack.c.bf16 %v1288_v18, %v1287_v17 }
 0x460   : > { %1408 = vmatmul.bf16.gmra.mxu3 %v1296_v19 }
 0x4a7   : > { %v1374_v21 = vpop.f32.mrf.mxu1 }
 0x4a8   : > { %v1375_v22 = vadd.f32 %v1988_v20, %v1374_v21 }
 0x4aa   : > { %1414 = vst [vmem:[#allocation14] sm:$0xff] %v1375_v22 }
 0x4af   : > { %v1376_v23 = vpop.f32.mrf.mxu1 }
 0x4b0   : > { %v1377_v24 = vadd.f32 %v1988_v20, %v1376_v23 }
 0x4b2   : > { %1415 = vst [vmem:[#allocation14 + $0x8] sm:$0xff] %v1377_v24 }
 0x4b3   : > { %v1394_v25 = vpop.f32.mrf.mxu3 }
 0x4b4   : > { %v1395_v26 = vadd.f32 %v1988_v20, %v1394_v25 }
 0x4b6   : > { %1422 = vst [vmem:[#allocation14 + $0x40] sm:$0xff] %v1395_v26 }
 0x4b7   : > { %v1379_v27 = vpop.f32.mrf.mxu1 }
 0x4b8   : > { %v1380_v28 = vadd.f32 %v1988_v20, %v1379_v27 }
 0x4ba   : > { %1416 = vst [vmem:[#allocation14 + $0x10] sm:$0xff] %v1380_v28 }
 0x4bb   : > { %v1396_v29 = vpop.f32.mrf.mxu3 }
 0x4bc   : > { %v1397_v30 = vadd.f32 %v1988_v20, %v1396_v29 }
 0x4be   : > { %1423 = vst [vmem:[#allocation14 + $0x48] sm:$0xff] %v1397_v30 }
 0x4bf   : > { %v1381_v31 = vpop.f32.mrf.mxu1 }
 0x4c0   : > { %v1382_v32 = vadd.f32 %v1988_v20, %v1381_v31 }
 0x4c2   : > { %1417 = vst [vmem:[#allocation14 + $0x18] sm:$0xff] %v1382_v32 }
 0x4c3   : > { %v1399_v33 = vpop.f32.mrf.mxu3 }
 0x4c4   : > { %v1400_v34 = vadd.f32 %v1988_v20, %v1399_v33 }
 0x4c6   : > { %1424 = vst [vmem:[#allocation14 + $0x50] sm:$0xff] %v1400_v34 }
 0x4c7   : > { %v1384_v35 = vpop.f32.mrf.mxu1 }
 0x4c8   : > { %v1385_v36 = vadd.f32 %v1988_v20, %v1384_v35 }
 0x4ca   : > { %1418 = vst [vmem:[#allocation14 + $0x20] sm:$0xff] %v1385_v36 }
 0x4cb   : > { %v1401_v37 = vpop.f32.mrf.mxu3 }
 0x4cc   : > { %v1402_v38 = vadd.f32 %v1988_v20, %v1401_v37 }
 0x4ce   : > { %1425 = vst [vmem:[#allocation14 + $0x58] sm:$0xff] %v1402_v38 }
 0x4cf   : > { %v1386_v39 = vpop.f32.mrf.mxu1 }
 0x4d0   : > { %v1387_v40 = vadd.f32 %v1988_v20, %v1386_v39 }
 0x4d2   : > { %1419 = vst [vmem:[#allocation14 + $0x28] sm:$0xff] %v1387_v40 }
 0x4d3   : > { %v1404_v41 = vpop.f32.mrf.mxu3 }
 0x4d4   : > { %v1405_v42 = vadd.f32 %v1988_v20, %v1404_v41 }
 0x4d6   : > { %1426 = vst [vmem:[#allocation14 + $0x60] sm:$0xff] %v1405_v42 }
 0x4d7   : > { %v1389_v43 = vpop.f32.mrf.mxu1 }
 0x4d8   : > { %v1390_v44 = vadd.f32 %v1988_v20, %v1389_v43 }
 0x4da   : > { %1420 = vst [vmem:[#allocation14 + $0x30] sm:$0xff] %v1390_v44 }
 0x4db   : > { %v1406_v45 = vpop.f32.mrf.mxu3 }
 0x4dc   : > { %v1407_v46 = vadd.f32 %v1988_v20, %v1406_v45 }
 0x4de   : > { %1427 = vst [vmem:[#allocation14 + $0x68] sm:$0xff] %v1407_v46 }
 0x4df   : > { %v1391_v47 = vpop.f32.mrf.mxu1 }
 0x4e0   : > { %v1392_v48 = vadd.f32 %v1988_v20, %v1391_v47 }
 0x4e2   : > { %1421 = vst [vmem:[#allocation14 + $0x38] sm:$0xff] %v1392_v48 }
 0x4e3   : > { %v1409_v49 = vpop.f32.mrf.mxu3 }
 0x4e4   : > { %v1410_v50 = vadd.f32 %v1988_v20, %v1409_v49 }
 0x4e6   : > { %1428 = vst [vmem:[#allocation14 + $0x70] sm:$0xff] %v1410_v50 }
 0x4eb   : > { %v1411_v51 = vpop.f32.mrf.mxu3 }
 0x4ec   : > { %v1412_v52 = vadd.f32 %v1988_v20, %v1411_v51 }
 0x4ee   : > { %1429 = vst [vmem:[#allocation14 + $0x78] sm:$0xff] %v1412_v52 }
 0x4ef PF: > { %p1937_p3 = scmp.eq.s32.totalorder %s2389_s28, 2  ;;  %s2297_s16 = smov [#allocation14]  }
 0x4f0   : > { %s1435_s26 = sshll.u32 %s2297_s16, 4  ;;  %s2604_s9 = sld [smem:[#allocation26_spill]]  ;;  %s1436_s26 = int_to_ptr.vmem [resolvable:$true] %s1435_s26 }
 0x4f1   : > { %s2298_s14 = smov 128   ;;  %s2299_s18 = smov 8  }
 0x4f6   : > { %s1437_s21 = sshll.u32 %s2604_s9, 4  ;;  %s1438_s21 = int_to_ptr.hbm [resolvable:$true] %s1437_s21 }
 0x4f7   : > { %1898 = dma.vmem_to_hbm [thread:$0]  (%p1937_p3), %s1436_s26, 2048, %s1438_s21, [#allocation5], %s2298_s14, %s2298_s14, %s2299_s18  }
 0x4f8   : > { %2268 = dma.done.wait (%p1937_p3), [#allocation5], 2048  }
 0x4f9   : > { %2270 = vsyncadd (%p1937_p3), [#allocation5], 4294965248 }
 0x4fa PF: > { %p23_p12 = scmp.ge.s32.totalorder %s2450_s15, 5   ;;  %s2605_s21 = smov %s2277_s22 }
 0x4fb   : > { %s2606_s22 = smov %s2281_s23  ;;  %s2607_s23 = smov %s2462_s13 }
 0x4fc   : > { %s2608_s24 = smov %s2450_s15  ;;  %25 = sbr.rel (!%p23_p12) target bundleno = 11 (0xb), region = 139 }
 0x501   :  { %1454 = vsyncpa [#allocation4], 1 }
 0x502   :  { %1456 = vsyncpa [#allocation4 + $0x1], 1 }
 0x503   :  { %1457 = vsyncpa [#allocation7], 1 }
 0x504   :  { %1458 = vsyncpa [#allocation10], 1 }
 0x505   :  { %1459 = vsyncpa [#allocation5], 1 }
 0x506   :  { %1461 = vsyncpa [#allocation5 + $0x1], 1 }

</bundles_post_ra>
